<compile_context>
chip_gen: v7x
topology: tpu7x:2x2x1
jax: 0.10.0
libtpu: 0.0.40
codegen_flags: <defaults>
</compile_context>

<pallas_src>
import functools

import jax
import jax.numpy as jnp
from jax.experimental import pallas as pl
from jax.experimental.pallas import tpu as pltpu


def _attention_kernel(q_ref, k_ref, v_ref, o_ref, *, scale_factor, matmul_dtype):
    # Refs are (Bb, S, D): Bb batch elements per grid step.
    q = q_ref[...]
    k = k_ref[...]
    v = v_ref[...]

    # Fold the scale into Q before the matmul (S*D work instead of S*S);
    # skip the multiply entirely when scale_factor == 1.0.
    if scale_factor != 1.0:
        q = q * jnp.asarray(scale_factor, q.dtype)
    q = q.astype(matmul_dtype)
    k = k.astype(matmul_dtype)

    # Batched QK^T: contraction over the last dim of both operands, f32 MXU
    # accumulation, no materialized transpose of the K tile.
    s = jnp.einsum("bqd,bkd->bqk", q, k, preferred_element_type=jnp.float32)

    # Numerically-stable softmax along the last axis, all in f32 on the
    # VPU/EUP (exact divide -- matches torch.softmax within fp reassociation).
    m = jnp.max(s, axis=-1, keepdims=True)
    p = jnp.exp(s - m)
    denom = jnp.sum(p, axis=-1, keepdims=True)
    p = p / denom

    # TODO(synk): dropout_p != 0 (training mode) would need
    # pltpu.prng_seed / pltpu.prng_random_bits masking + 1/(1-p) rescale.

    # output = P @ V, batched, f32 accumulation.
    out = jnp.einsum(
        "bqk,bkd->bqd",
        p.astype(matmul_dtype),
        v.astype(matmul_dtype),
        preferred_element_type=jnp.float32,
    )
    o_ref[...] = out.astype(o_ref.dtype)


def _per_batch_vmem_bytes(S, D, itemsize):
    # Double-buffered Q/K/V/O tiles + ~3 f32 (S,S) softmax intermediates
    # (scores, exp, probs) per batch element.
    return 2 * 4 * S * D * itemsize + 3 * S * S * 4


def _pick_block_b(B, S, D, itemsize, vmem_budget_bytes=12 << 20, cap=128):
    """Largest divisor of B that fits the VMEM budget (and keeps >=2 grid
    steps when B >= 2, so both v7x TensorCores get work)."""
    per_b = _per_batch_vmem_bytes(S, D, itemsize)
    max_b = max(1, min(cap, vmem_budget_bytes // per_b))
    if B >= 2:
        max_b = min(max_b, B // 2)
    max_b = max(1, max_b)
    bb = 1
    for d in range(1, min(B, max_b) + 1):
        if B % d == 0:
            bb = d
    return bb


def attention(query, key, value, scale_factor=1.0, dropout_p=0.0,
              block_b=None, use_bf16_matmul=False):
    """Scaled dot-product attention, inputs/outputs (B, S, D) like the module.

    use_bf16_matmul=True is the MXU fast path (softmax stays f32); keep the
    default (False) when exact torch parity is required.
    """
    assert dropout_p == 0.0, "only inference (dropout_p=0.0) is implemented"
    B, S, D = query.shape
    elt = jnp.dtype(query.dtype).itemsize

    if block_b is None:
        block_b = _pick_block_b(B, S, D, elt)
    assert B % block_b == 0, "B must be divisible by block_b"

    matmul_dtype = jnp.bfloat16 if use_bf16_matmul else query.dtype
    kernel = functools.partial(
        _attention_kernel, scale_factor=scale_factor, matmul_dtype=matmul_dtype
    )

    # Accurate VMEM estimate (inputs/outputs double-buffered + f32 score
    # intermediates).  Only raise the scoped limit when we actually exceed
    # the most conservative default (16 MiB on v5e); cap at v7x physical.
    vmem_est = block_b * _per_batch_vmem_bytes(S, D, elt) + (2 << 20)
    vmem_limit = min(int(vmem_est), 64 << 20) if vmem_est > (16 << 20) else None

    return pl.pallas_call(
        kernel,
        out_shape=jax.ShapeDtypeStruct((B, S, D), query.dtype),
        grid_spec=pltpu.PrefetchScalarGridSpec(
            num_scalar_prefetch=0,
            grid=(B // block_b,),
            in_specs=[
                pl.BlockSpec((block_b, S, D), lambda b: (b, 0, 0)),
                pl.BlockSpec((block_b, S, D), lambda b: (b, 0, 0)),
                pl.BlockSpec((block_b, S, D), lambda b: (b, 0, 0)),
            ],
            out_specs=pl.BlockSpec((block_b, S, D), lambda b: (b, 0, 0)),
        ),
        compiler_params=pltpu.CompilerParams(
            dimension_semantics=("parallel",),
            vmem_limit_bytes=vmem_limit,
        ),
    )(query, key, value)


def reference(query, key, value, scale_factor=1.0):
    qk = jnp.einsum("bqd,bkd->bqk", query, key) * scale_factor
    p = jax.nn.softmax(qk, axis=-1)
    return jnp.einsum("bqk,bkd->bqd", p, value)


if __name__ == "__main__":
    # Same shapes as the PyTorch script: (1, 32, 64).
    B, S, D = 1, 32, 64
    k0, k1, k2 = jax.random.split(jax.random.PRNGKey(0), 3)
    query = jax.random.normal(k0, (B, S, D), dtype=jnp.float32)
    key = jax.random.normal(k1, (B, S, D), dtype=jnp.float32)
    value = jax.random.normal(k2, (B, S, D), dtype=jnp.float32)

    # f32 path (exact module semantics).
    out = attention(query, key, value, scale_factor=1.0, dropout_p=0.0)
    out = jax.block_until_ready(out)
    ref = reference(query, key, value, scale_factor=1.0)
    assert out.shape == (B, S, D)
    assert jnp.allclose(out, ref, atol=1e-3, rtol=1e-3)

    # Batched path: block_b is auto-derived (B=8 -> block_b=4, grid=(2,),
    # keeping both v7x TensorCores busy), exact f32 math.
    B2 = 8
    k3, k4, k5 = jax.random.split(jax.random.PRNGKey(1), 3)
    q2 = jax.random.normal(k3, (B2, S, D), dtype=jnp.float32)
    kk2 = jax.random.normal(k4, (B2, S, D), dtype=jnp.float32)
    v2 = jax.random.normal(k5, (B2, S, D), dtype=jnp.float32)

    out2 = attention(q2, kk2, v2, scale_factor=0.125)
    out2 = jax.block_until_ready(out2)
    ref2 = reference(q2, kk2, v2, scale_factor=0.125)
    assert jnp.allclose(out2, ref2, atol=1e-3, rtol=1e-3)

    # bf16-MXU fast path (softmax stays f32), validated at looser tolerance.
    out3 = attention(q2, kk2, v2, scale_factor=0.125, use_bf16_matmul=True)
    out3 = jax.block_until_ready(out3)
    assert jnp.allclose(out3, ref2, atol=5e-2, rtol=5e-2)

    print("KERNEL_OK")
</pallas_src>

<mosaic_0001>
module attributes {stable_mosaic.version = 11 : i64} {
  func.func @_attention_kernel(%arg0: i32, %arg1: memref<1x32x64xf32, #tpu.memory_space<vmem>>, %arg2: memref<1x32x64xf32, #tpu.memory_space<vmem>>, %arg3: memref<1x32x64xf32, #tpu.memory_space<vmem>>, %arg4: memref<1x32x64xf32, #tpu.memory_space<vmem>>) attributes {dimension_semantics = [#tpu.dimension_semantics<parallel>], iteration_bounds = array<i64: 1>, scalar_prefetch = 0 : i64, scratch_operands = 0 : i64, tpu.core_type = #tpu.core_type<tc>, window_params = [{transform_indices = @transform_0, window_bounds = array<i64: 1, 32, 64>}, {transform_indices = @transform_1, window_bounds = array<i64: 1, 32, 64>}, {transform_indices = @transform_2, window_bounds = array<i64: 1, 32, 64>}, {transform_indices = @transform_3, window_bounds = array<i64: 1, 32, 64>}]} {
    %c0 = arith.constant 0 : index
    %c0_0 = arith.constant 0 : index
    %c0_1 = arith.constant 0 : index
    %0 = vector.load %arg1[%c0, %c0_0, %c0_1] : memref<1x32x64xf32, #tpu.memory_space<vmem>>, vector<1x32x64xf32>
    %c0_2 = arith.constant 0 : index
    %c0_3 = arith.constant 0 : index
    %c0_4 = arith.constant 0 : index
    %1 = vector.load %arg2[%c0_2, %c0_3, %c0_4] : memref<1x32x64xf32, #tpu.memory_space<vmem>>, vector<1x32x64xf32>
    %c0_5 = arith.constant 0 : index
    %c0_6 = arith.constant 0 : index
    %c0_7 = arith.constant 0 : index
    %2 = vector.load %arg3[%c0_5, %c0_6, %c0_7] : memref<1x32x64xf32, #tpu.memory_space<vmem>>, vector<1x32x64xf32>
    "tpu.trace_start"() <{level = 10 : i32, message = "bqd,bkd->bqk"}> : () -> ()
    %cst = arith.constant dense<0.000000e+00> : vector<1x32x32xf32>
    %3 = tpu.matmul %0, %1, %cst {dimension_numbers = #tpu.dot_dimension_numbers<[2], [2], [1], [1], [0, 0, 0, 1, 1, 1], [0], [0]>} : vector<1x32x64xf32>, vector<1x32x64xf32>, vector<1x32x32xf32> -> vector<1x32x32xf32>
    "tpu.trace_stop"() : () -> ()
    %cst_8 = arith.constant dense<0xFF800000> : vector<1x32xf32>
    %4 = vector.multi_reduction <maximumf>, %3, %cst_8 [2] : vector<1x32x32xf32> to vector<1x32xf32>
    %5 = vector.shape_cast %4 : vector<1x32xf32> to vector<1x32x1xf32>
    %6 = vector.broadcast %5 : vector<1x32x1xf32> to vector<1x32x32xf32>
    %7 = arith.subf %3, %6 : vector<1x32x32xf32>
    %8 = math.exp %7 : vector<1x32x32xf32>
    %cst_9 = arith.constant dense<0.000000e+00> : vector<1x32xf32>
    %9 = vector.multi_reduction <add>, %8, %cst_9 [2] : vector<1x32x32xf32> to vector<1x32xf32>
    %10 = vector.shape_cast %9 : vector<1x32xf32> to vector<1x32x1xf32>
    %11 = vector.broadcast %10 : vector<1x32x1xf32> to vector<1x32x32xf32>
    %12 = arith.divf %8, %11 : vector<1x32x32xf32>
    "tpu.trace_start"() <{level = 10 : i32, message = "bqk,bkd->bqd"}> : () -> ()
    %cst_10 = arith.constant dense<0.000000e+00> : vector<1x32x64xf32>
    %13 = tpu.matmul %12, %2, %cst_10 {dimension_numbers = #tpu.dot_dimension_numbers<[2], [1], [1], [2], [0, 0, 0, 1, 1, 2], [0], [0]>} : vector<1x32x32xf32>, vector<1x32x64xf32>, vector<1x32x64xf32> -> vector<1x32x64xf32>
    "tpu.trace_stop"() : () -> ()
    %c0_11 = arith.constant 0 : index
    %c0_12 = arith.constant 0 : index
    %c0_13 = arith.constant 0 : index
    %14 = vector.load %arg4[%c0_11, %c0_12, %c0_13] : memref<1x32x64xf32, #tpu.memory_space<vmem>>, vector<1x32x64xf32>
    tpu.vector_store %arg4[%c0_11, %c0_12, %c0_13], %13 {strides = array<i32>} : memref<1x32x64xf32, #tpu.memory_space<vmem>>, vector<1x32x64xf32>,
    return
  }
  func.func @transform_0(%arg0: i32) -> (i32, i32, i32) {
    %c0_i32 = arith.constant 0 : i32
    %c0_i32_0 = arith.constant 0 : i32
    %c0_i32_1 = arith.constant 0 : i32
    return %arg0, %c0_i32, %c0_i32_0 : i32, i32, i32
  }
  func.func @transform_1(%arg0: i32) -> (i32, i32, i32) {
    %c0_i32 = arith.constant 0 : i32
    %c0_i32_0 = arith.constant 0 : i32
    %c0_i32_1 = arith.constant 0 : i32
    return %arg0, %c0_i32, %c0_i32_0 : i32, i32, i32
  }
  func.func @transform_2(%arg0: i32) -> (i32, i32, i32) {
    %c0_i32 = arith.constant 0 : i32
    %c0_i32_0 = arith.constant 0 : i32
    %c0_i32_1 = arith.constant 0 : i32
    return %arg0, %c0_i32, %c0_i32_0 : i32, i32, i32
  }
  func.func @transform_3(%arg0: i32) -> (i32, i32, i32) {
    %c0_i32 = arith.constant 0 : i32
    %c0_i32_0 = arith.constant 0 : i32
    %c0_i32_1 = arith.constant 0 : i32
    return %arg0, %c0_i32, %c0_i32_0 : i32, i32, i32
  }
}

</mosaic_0001>

<bundles_post_ra>
// kernel: tpu_custom_call.1
= control target key start
LH: loop header
LB: loop body
LE: loop exit
PB: predicated region body
PF: predicated region fallthrough
CT: control target
= control target key end

     0   :  { %8 = vsyncpa [#allocation3], 0  ;;  %s649_s0 = inlined_call_operand.hbm [shape: f32[1,32,64], index: 0, kind: input, shape index: {}]   ;;  %s650_s1 = inlined_call_operand.hbm [shape: f32[1,32,64], index: 1, kind: input, shape index: {}]   ;;  %s651_s2 = inlined_call_operand.hbm [shape: f32[1,32,64], index: 2, kind: input, shape index: {}]   ;;  %s652_s3 = inlined_call_operand.hbm [shape: f32[1,32,64], index: 3, kind: output, shape index: {}]  }
   0x1   :  { %9 = vsyncpa [#allocation6], 0 }
   0x2   :  { %10 = vsyncpa [#allocation4], 0  ;;  %s534_s12 = smov [#allocation5]   ;;  %s535_s14 = smov [#allocation2]  }
   0x3   :  { %s28_s13 = sshll.u32 %s534_s12, 4  ;;  %s16_s15 = sshll.u32 %s535_s14, 4  ;;  %s29_s13 = int_to_ptr.vmem [resolvable:$true] %s28_s13  ;;  %s560_s15 = int_to_ptr.vmem [resolvable:$true] %s16_s15 }
   0x4   :  { %s440_s18 = scalar_lea.hbm %s650_s1, 512 }
   0x5   :  { %p441_p0 = scmp.ne.s32.totalorder %s650_s1, %s440_s18  ;;  %p444_p1 = scmp.lt.u32.totalorder %s440_s18, %s650_s1 }
   0x7   :  { %p446_p2 = pnand %p444_p1, %p441_p0 }
   0x9   :  { %449 = shalt.err (!%p446_p2)
}
   0xa   :  { %s450_s23 = scalar_lea.vmem %s29_s13, 512  ;;  %p455_p4 = scmp.lt.s32.totalorder %s29_s13, %s29_s13 }
   0xb   :  { %p451_p3 = scmp.ne.s32.totalorder %s29_s13, %s450_s23  ;;  %p456_p5 = scmp.lt.s32.totalorder %s450_s23, %s450_s23 }
   0xd   :  { %p457_p6 = por %p456_p5, %p455_p4 }
   0xf   :  { %p458_p7 = pnand %p457_p6, %p451_p3 }
  0x11   :  { %461 = shalt.err (!%p458_p7)
}
  0x12   :  { %s536_s24 = smov 128   ;;  %s537_s25 = smov 8  }
  0x13   :  { %34 = dma.hbm_to_vmem [thread:$0]  %s650_s1, 512, %s29_s13, [#allocation6], %s536_s24, %s536_s24, %s537_s25  }
  0x14   :  { %s462_s30 = scalar_lea.hbm %s649_s0, 512 }
  0x15   :  { %p463_p8 = scmp.ne.s32.totalorder %s649_s0, %s462_s30  ;;  %p466_p9 = scmp.lt.u32.totalorder %s462_s30, %s649_s0 }
  0x17   :  { %p468_p10 = pnand %p466_p9, %p463_p8 }
  0x19   :  { %471 = shalt.err (!%p468_p10)
}
  0x1a   :  { %s472_s8 = scalar_lea.vmem %s560_s15, 512  ;;  %p477_p12 = scmp.lt.s32.totalorder %s560_s15, %s560_s15 }
  0x1b   :  { %p473_p11 = scmp.ne.s32.totalorder %s560_s15, %s472_s8  ;;  %p478_p13 = scmp.lt.s32.totalorder %s472_s8, %s472_s8 }
  0x1d   :  { %p479_p0 = por %p478_p13, %p477_p12 }
  0x1f   :  { %p480_p1 = pnand %p479_p0, %p473_p11 }
  0x21   :  { %483 = shalt.err (!%p480_p1)
}
  0x22   :  { %22 = dma.hbm_to_vmem [thread:$0]  %s649_s0, 512, %s560_s15, [#allocation3], %s536_s24, %s536_s24, %s537_s25  }
  0x23   :  { %s538_s10 = smov [#allocation7]   ;;  %s484_s14 = scalar_lea.hbm %s651_s2, 512 }
  0x24   :  { %s40_s11 = sshll.u32 %s538_s10, 4  ;;  %p485_p2 = scmp.ne.s32.totalorder %s651_s2, %s484_s14  ;;  %s41_s11 = int_to_ptr.vmem [resolvable:$true] %s40_s11 }
  0x25   :  { %p488_p3 = scmp.lt.u32.totalorder %s484_s14, %s651_s2 }
  0x27   :  { %p490_p4 = pnand %p488_p3, %p485_p2 }
  0x29   :  { %493 = shalt.err (!%p490_p4)
}
  0x2a   :  { %s494_s20 = scalar_lea.vmem %s41_s11, 512  ;;  %p499_p6 = scmp.lt.s32.totalorder %s41_s11, %s41_s11 }
  0x2b   :  { %p495_p5 = scmp.ne.s32.totalorder %s41_s11, %s494_s20  ;;  %p500_p7 = scmp.lt.s32.totalorder %s494_s20, %s494_s20 }
  0x2d   :  { %p501_p8 = por %p500_p7, %p499_p6 }
  0x2f   :  { %p502_p9 = pnand %p501_p8, %p495_p5 }
  0x31   :  { %505 = shalt.err (!%p502_p9)
}
  0x32   :  { %46 = dma.hbm_to_vmem [thread:$0]  %s651_s2, 512, %s41_s11, [#allocation6], %s536_s24, %s536_s24, %s537_s25  }
  0x33   :  { %528 = dma.done.wait [#allocation3], 512  }
  0x34   :  { %529 = vsyncadd [#allocation3], 4294966784 }
  0x35   :  { %530 = dma.done.wait [#allocation6], 1024  }
  0x36   :  { %531 = vsyncadd [#allocation6], 4294966272  ;;  %vm68_vm0 = vcmask 523264   ;;  %v60_v0 = vld [vmem:[#allocation5] sm:$0xff]  ;;  %v61_v1 = vld [vmem:[#allocation5 + $0x8] sm:$0xff]  ;;  %vm178_vm2 = vcmask 261120  }
  0x37   :  { %vm399_vm1 = vmpackc.low %vm68_vm0, %vm68_vm0  ;;  %v62_v2 = vld [vmem:[#allocation5 + $0x10] sm:$0xff]  ;;  %v398_v3 = vpack.c.bf16 %v61_v1, %v60_v0  ;;  %v63_v4 = vld [vmem:[#allocation5 + $0x18] sm:$0xff]  ;;  %s539_s2 = smov [#allocation8]  }
  0x38   :  { %v56_v5 = vld [vmem:[#allocation2] sm:$0xff]  ;;  %v404_v6 = vpack.c.bf16 %v63_v4, %v62_v2  ;;  %v57_v7 = vld [vmem:[#allocation2 + $0x8] sm:$0xff]  ;;  %v58_v8 = vld [vmem:[#allocation2 + $0x10] sm:$0xff]  ;;  %s329_s21 = sshll.u32 %s539_s2, 4  ;;  %s330_s21 = int_to_ptr.vmem [resolvable:$true] %s329_s21 }
  0x39   :  { %378 = vmatprep.mubr.msk.f32.mxu0 %vm68_vm0, %v56_v5  ;;  %400 = vmatprep.subr.msk.bf16.mxu0 %vm399_vm1, %v398_v3  ;;  %v59_v9 = vld [vmem:[#allocation2 + $0x18] sm:$0xff]  ;;  %v64_v38 = vld [vmem:[#allocation7] sm:$0xff]  ;;  %v65_v39 = vld [vmem:[#allocation7 + $0x8] sm:$0xff]  ;;  %s506_s22 = scalar_lea.vmem %s330_s21, 512  ;;  %p511_p11 = scmp.lt.s32.totalorder %s330_s21, %s330_s21 }
  0x3a   :  { %403 = vmatpush3.bf16.xpose.msk.msra.mxu0 %vm399_vm1, %v398_v3  ;;  %v410_v40 = vpack.c.bf16 %v65_v39, %v64_v38  ;;  %v66_v41 = vld [vmem:[#allocation7 + $0x10] sm:$0xff]  ;;  %v67_v42 = vld [vmem:[#allocation7 + $0x18] sm:$0xff]  ;;  %p507_p10 = scmp.ne.s32.totalorder %s330_s21, %s506_s22  ;;  %p512_p12 = scmp.lt.s32.totalorder %s506_s22, %s506_s22 }
  0x3b   :  { %406 = vmatprep.subr.msk.bf16.mxu0 %vm399_vm1, %v404_v6  ;;  %v414_v43 = vpack.c.bf16 %v67_v42, %v66_v41 }
  0x3c   :  { %411 = vmatprep.subr.bf16.mxu1 %v410_v40  ;;  %p513_p13 = por %p512_p12, %p511_p11 }
  0x3d   :  { %413 = vmatpush3.bf16.msra.mxu1 %v410_v40 }
  0x3e   :  { %415 = vmatprep.subr.bf16.mxu1 %v414_v43  ;;  %p514_p0 = pnand %p513_p13, %p507_p10 }
  0x41   :  { %417 = vmatpush3.bf16.msra.mxu1 %v414_v43 }
  0x42   :  { %409 = vmatpush3.bf16.xpose.msk.msra.mxu0 %vm399_vm1, %v404_v6 }
  0x49   :  { %379 = vmatmul.mubr.msk.f32.vlgmr.msra.gmra.mrb[0].mxu0 %vm68_vm0, %v57_v7 }
  0x4a   :  { %381 = vmatprep.mubr.msk.f32.mxu0 %vm68_vm0, %v58_v8 }
  0x4d   :  { %382 = vmatmul.mubr.msk.f32.gmra.mrb[2].mxu0 %vm68_vm0, %v59_v9 }
 0x11c   :  { %v380_v10 = vpop.f32.mrb[0].mxu0 }
 0x11d   :  { %v159_v11 = vpop.f32.mrb[1].mxu0  ;;  %v182_v15 = vsel %vm178_vm2, %v380_v10, -inf }
 0x11e   :  { %v179_v12 = vsel %vm178_vm2, %v159_v11, -inf }
 0x11f   :  { %180 = vmax.xlane.f32.xlu0 %v179_v12 }
 0x120   :  { %v383_v13 = vpop.f32.mrb[2].mxu0 }
 0x121   :  { %v169_v14 = vpop.f32.mrb[3].mxu0  ;;  %v188_v17 = vsel %vm178_vm2, %v383_v13, -inf }
 0x122   :  { %v185_v16 = vsel %vm178_vm2, %v169_v14, -inf }
 0x123   :  { %183 = vmax.xlane.f32.xlu0 %v182_v15  ;;  %186 = vmax.xlane.f32.xlu1 %v185_v16 }
 0x127   :  { %189 = vmax.xlane.f32.xlu1 %v188_v17 }
 0x1ac   :  { %v181_v18 = vpop.xlane.xlu0 %180 }
 0x1ad   :  { %v191_v19 = vsub.f32 %v159_v11, %v181_v18 }
 0x1af   :  { %v195_v20 = vmul.f32 1.442695, %v191_v19 }
 0x1b0   :  { %v184_v21 = vpop.xlane.xlu0 %183  ;;  %v187_v22 = vpop.xlane.xlu1 %186 }
 0x1b1   :  { %424 = vpow2.f32 %v195_v20  ;;  %v192_v23 = vsub.f32 %v380_v10, %v184_v21  ;;  %v193_v24 = vsub.f32 %v169_v14, %v187_v22 }
 0x1b3   :  { %v197_v25 = vmul.f32 1.442695, %v192_v23  ;;  %v199_v26 = vmul.f32 1.442695, %v193_v24 }
 0x1b4   :  { %v190_v27 = vpop.xlane.xlu1 %189 }
 0x1b5   :  { %426 = vpow2.f32 %v197_v25  ;;  %v194_v28 = vsub.f32 %v383_v13, %v190_v27 }
 0x1b6   :  { %428 = vpow2.f32 %v199_v26 }
 0x1b7   :  { %v201_v29 = vmul.f32 1.442695, %v194_v28 }
 0x1b9   :  { %430 = vpow2.f32 %v201_v29 }
 0x1bb   :  { %v425_v30 = vpop.eup %424 }
 0x1bc   :  { %v203_v31 = vsel %vm178_vm2, %v425_v30, 0.0 }
 0x1bd   :  { %204 = vadd.xlane.f32.xlu0 %v203_v31 }
 0x1bf   :  { %v427_v32 = vpop.eup %426 }
 0x1c0   :  { %v429_v33 = vpop.eup %428  ;;  %v206_v34 = vsel %vm178_vm2, %v427_v32, 0.0 }
 0x1c1   :  { %207 = vadd.xlane.f32.xlu1 %v206_v34  ;;  %v209_v35 = vsel %vm178_vm2, %v429_v33, 0.0 }
 0x1c2   :  { %210 = vadd.xlane.f32.xlu0 %v209_v35 }
 0x1c3   :  { %v431_v36 = vpop.eup %430 }
 0x1c4   :  { %v212_v37 = vsel %vm178_vm2, %v431_v36, 0.0 }
 0x1c5   :  { %213 = vadd.xlane.f32.xlu1 %v212_v37 }
 0x24a   :  { %v205_v44 = vpop.xlane.xlu0 %204 }
 0x24b   :  { %432 = vrcp.f32 %v205_v44 }
 0x24e   :  { %v208_v45 = vpop.xlane.xlu1 %207 }
 0x24f   :  { %v211_v46 = vpop.xlane.xlu0 %210  ;;  %434 = vrcp.f32 %v208_v45 }
 0x250   :  { %436 = vrcp.f32 %v211_v46 }
 0x252   :  { %v214_v47 = vpop.xlane.xlu1 %213 }
 0x253   :  { %438 = vrcp.f32 %v214_v47 }
 0x255   :  { %v433_v48 = vpop.eup %432 }
 0x256   :  { %v216_v49 = vmul.f32 %v433_v48, %v425_v30 }
 0x258   :  { %392 = vmatprep.mubr.msk.f32.mxu1 %vm178_vm2, %v216_v49 }
 0x259   :  { %v435_v50 = vpop.eup %434 }
 0x25a   :  { %v437_v51 = vpop.eup %436  ;;  %v218_v52 = vmul.f32 %v435_v50, %v427_v32 }
 0x25b   :  { %v220_v53 = vmul.f32 %v437_v51, %v429_v33 }
 0x25c   :  { %393 = vmatmul.mubr.msk.f32.vlgmr.msra.gmra.mrb[0].mxu1 %vm178_vm2, %v218_v52 }
 0x25d   :  { %v439_v54 = vpop.eup %438  ;;  %395 = vmatprep.mubr.msk.f32.mxu1 %vm178_vm2, %v220_v53 }
 0x25e   :  { %v222_v55 = vmul.f32 %v439_v54, %v431_v36 }
 0x260   :  { %396 = vmatmul.mubr.msk.f32.gmra.mrb[2].mxu1 %vm178_vm2, %v222_v55 }
 0x32f   :  { %v394_v56 = vpop.f32.mrb[0].mxu1 }
 0x330   :  { %321 = vst.msk [vmem:[#allocation8 + $0x8] sm:$0xff] %vm68_vm0, %v394_v56  ;;  %v301_v57 = vpop.f32.mrb[1].mxu1 }
 0x331   :  { %320 = vst.msk [vmem:[#allocation8] sm:$0xff] %vm68_vm0, %v301_v57 }
 0x333   :  { %v397_v58 = vpop.f32.mrb[2].mxu1 }
 0x334   :  { %323 = vst.msk [vmem:[#allocation8 + $0x18] sm:$0xff] %vm68_vm0, %v397_v58  ;;  %v311_v59 = vpop.f32.mrb[3].mxu1 }
 0x335   :  { %322 = vst.msk [vmem:[#allocation8 + $0x10] sm:$0xff] %vm68_vm0, %v311_v59 }
 0x336   :  { %517 = shalt.err (!%p514_p0)
}
 0x337   :  { %s518_s27 = scalar_lea.hbm %s652_s3, 512 }
 0x338   :  { %p519_p1 = scmp.ne.s32.totalorder %s652_s3, %s518_s27  ;;  %p522_p2 = scmp.lt.u32.totalorder %s518_s27, %s652_s3 }
 0x33a   :  { %p524_p3 = pnand %p522_p2, %p519_p1 }
 0x33c   :  { %527 = shalt.err (!%p524_p3)
}
 0x33d   :  { %335 = dma.vmem_to_hbm [thread:$0]  %s330_s21, 512, %s652_s3, [#allocation4], %s536_s24, %s536_s24, %s537_s25  }
 0x33e   :  { %532 = dma.done.wait [#allocation4], 512  }
 0x33f   :  { %533 = vsyncadd [#allocation4], 4294966784 }
 0x340   :  { %339 = vsyncpa [#allocation3], 1 }
 0x341   :  { %340 = vsyncpa [#allocation6], 1 }
 0x342   :  { %341 = vsyncpa [#allocation4], 1 }

</bundles_post_ra>
